<compile_context>
chip_gen: v6e
topology: v6e:2x2x1
jax: 0.10.0
libtpu: 0.0.40
codegen_flags: <defaults>
</compile_context>

<pallas_src>
import functools
import math

import jax
import jax.numpy as jnp
from jax import lax
from jax.experimental import pallas as pl
from jax.experimental.pallas import tpu as pltpu

LANES = 128
CHUNK_ROWS = 512           # in-kernel accumulation chunk: (512,128) f32 = 256 KiB
MAX_TILE_ROWS = 4096       # reduce/count kernels: 2 MiB per input per buffer
MAX_TILE_ROWS_ELEM = 2048  # 'none' loss kernel: 3 double-buffered streams
VMEM_LIMIT = 32 * 1024 * 1024


# ----------------------------------------------------------------------------
# small static helpers
# ----------------------------------------------------------------------------
def _ceil_div(a, b):
    return -(-a // b)


def _round_up(a, m):
    return _ceil_div(a, m) * m


def _pick_tiles(rows, max_tile_rows):
    """Return (tile_rows, num_tiles, chunk_rows); tile % chunk == 0, tile % 8 == 0,
    and >= 2 grid steps whenever rows allows (v7x has 2 TensorCores/chip)."""
    rows8 = _round_up(rows, 8)
    if rows8 <= CHUNK_ROWS:
        tile = 8 if rows8 <= 8 else _round_up(_ceil_div(rows, 2), 8)
    else:
        tile = min(max_tile_rows, _round_up(rows8, CHUNK_ROWS))
        if _ceil_div(rows, tile) < 2:
            tile = _round_up(_ceil_div(rows, 2), CHUNK_ROWS)
    num = _ceil_div(rows, tile)
    chunk = min(CHUNK_ROWS, tile)
    assert tile % chunk == 0 and tile % 8 == 0
    return tile, num, chunk


# ----------------------------------------------------------------------------
# in-kernel math helpers
# ----------------------------------------------------------------------------
def _log_sigmoid_terms(x):
    """(log_sigmoid(x), log_sigmoid(-x)) sharing one softplus term."""
    s = jnp.log1p(jnp.exp(-jnp.abs(x)))        # 1 exp + 1 log per element (EUP)
    return jnp.minimum(x, 0.0) - s, -jnp.maximum(x, 0.0) - s


def _fold8(v):
    """(chunk_rows, LANES) -> (8, LANES) partial sums (vreg-aligned fold)."""
    return jnp.sum(v.reshape(-1, 8, v.shape[-1]), axis=0)


# ----------------------------------------------------------------------------
# kernel 1: single-pass reduction for reduction in {'mean', 'sum'}
#   per-tile (8, 4*128) output: [S_pos | S_neg | count(t==1) | count(t==0)]
# ----------------------------------------------------------------------------
def _reduce_kernel(x_ref, t_ref, out_ref, *, valid_rows, ignore_value,
                   needs_mask, chunk_rows):
    tile_rows = x_ref.shape[0]
    n_chunks = tile_rows // chunk_rows
    row0 = pl.program_id(0) * tile_rows
    one = jnp.float32(1.0)
    zero = jnp.float32(0.0)

    def step_rows(r, carry):
        acc_pos, acc_neg, acc_cp, acc_cn = carry
        x = x_ref[pl.ds(r, chunk_rows), :].astype(jnp.float32)
        t = t_ref[pl.ds(r, chunk_rows), :].astype(jnp.float32)
        ls_pos, ls_neg = _log_sigmoid_terms(x)
        is_pos = t == one
        is_neg = t == zero
        if needs_mask:  # ragged last grid block: mask rows >= valid_rows
            row = lax.broadcasted_iota(jnp.int32, t.shape, 0) + (row0 + r)
            valid = row < valid_rows
            is_pos = jnp.logical_and(is_pos, valid)
            is_neg = jnp.logical_and(is_neg, valid)
        keep_pos, keep_neg = is_pos, is_neg
        if ignore_value is not None:  # ignore affects the loss terms, not counts
            keep = t != jnp.float32(ignore_value)
            keep_pos = jnp.logical_and(keep_pos, keep)
            keep_neg = jnp.logical_and(keep_neg, keep)
        # where-selects (not multiplies): exact for hard 0/1 targets and robust
        # against unspecified OOB contents of ragged blocks.
        return (acc_pos + _fold8(jnp.where(keep_pos, ls_pos, zero)),
                acc_neg + _fold8(jnp.where(keep_neg, ls_neg, zero)),
                acc_cp + _fold8(jnp.where(is_pos, one, zero)),
                acc_cn + _fold8(jnp.where(is_neg, one, zero)))

    init = (jnp.zeros((8, LANES), jnp.float32),) * 4
    if n_chunks == 1:
        acc_pos, acc_neg, acc_cp, acc_cn = step_rows(0, init)
    else:
        acc_pos, acc_neg, acc_cp, acc_cn = lax.fori_loop(
            0, n_chunks,
            lambda c, carry: step_rows(pl.multiple_of(c * chunk_rows, 8), carry),
            init, unroll=True)

    out_ref[:, 0 * LANES:1 * LANES] = acc_pos
    out_ref[:, 1 * LANES:2 * LANES] = acc_neg
    out_ref[:, 2 * LANES:3 * LANES] = acc_cp
    out_ref[:, 3 * LANES:4 * LANES] = acc_cn


# ----------------------------------------------------------------------------
# kernel 2a: count pass for reduction='none' (streams only targets)
# ----------------------------------------------------------------------------
def _count_kernel(t_ref, out_ref, *, valid_rows, needs_mask, chunk_rows):
    tile_rows = t_ref.shape[0]
    n_chunks = tile_rows // chunk_rows
    row0 = pl.program_id(0) * tile_rows
    one = jnp.float32(1.0)
    zero = jnp.float32(0.0)

    def step_rows(r, carry):
        acc_cp, acc_cn = carry
        t = t_ref[pl.ds(r, chunk_rows), :].astype(jnp.float32)
        is_pos = t == one
        is_neg = t == zero
        if needs_mask:
            row = lax.broadcasted_iota(jnp.int32, t.shape, 0) + (row0 + r)
            valid = row < valid_rows
            is_pos = jnp.logical_and(is_pos, valid)
            is_neg = jnp.logical_and(is_neg, valid)
        return (acc_cp + _fold8(jnp.where(is_pos, one, zero)),
                acc_cn + _fold8(jnp.where(is_neg, one, zero)))

    init = (jnp.zeros((8, LANES), jnp.float32),) * 2
    if n_chunks == 1:
        acc_cp, acc_cn = step_rows(0, init)
    else:
        acc_cp, acc_cn = lax.fori_loop(
            0, n_chunks,
            lambda c, carry: step_rows(pl.multiple_of(c * chunk_rows, 8), carry),
            init, unroll=True)

    out_ref[:, :LANES] = acc_cp
    out_ref[:, LANES:] = acc_cn


# ----------------------------------------------------------------------------
# kernel 2b: per-element weighted loss for reduction='none'
#   w_ref (scalar prefetch, SMEM): [pos_weight**gamma, neg_weight**gamma]
# ----------------------------------------------------------------------------
def _loss_kernel(w_ref, x_ref, t_ref, o_ref, *, ignore_value):
    x = x_ref[...].astype(jnp.float32)
    t = t_ref[...].astype(jnp.float32)
    ls_pos, ls_neg = _log_sigmoid_terms(x)
    loss = -(w_ref[0] * (t * ls_pos) + w_ref[1] * ((1.0 - t) * ls_neg))
    if ignore_value is not None:
        loss = jnp.where(t == jnp.float32(ignore_value), 0.0, loss)
    o_ref[...] = loss


# ----------------------------------------------------------------------------
# plain-JAX helpers for the (<128-element) ragged tail and the scalar epilogue
# ----------------------------------------------------------------------------
def _jax_partials(x, t, ignore_value):
    x = x.reshape(-1).astype(jnp.float32)
    t = t.reshape(-1).astype(jnp.float32)
    ls_pos, ls_neg = _log_sigmoid_terms(x)
    is_pos = t == 1.0
    is_neg = t == 0.0
    keep_pos, keep_neg = is_pos, is_neg
    if ignore_value is not None:
        keep = t != jnp.float32(ignore_value)
        keep_pos = jnp.logical_and(keep_pos, keep)
        keep_neg = jnp.logical_and(keep_neg, keep)
    return (jnp.sum(jnp.where(keep_pos, ls_pos, 0.0)),
            jnp.sum(jnp.where(keep_neg, ls_neg, 0.0)),
            jnp.sum(is_pos).astype(jnp.int32),
            jnp.sum(is_neg).astype(jnp.int32))


def _jax_loss(x, t, w_pos, w_neg, ignore_value):
    x = x.astype(jnp.float32)
    t = t.astype(jnp.float32)
    ls_pos, ls_neg = _log_sigmoid_terms(x)
    loss = -(w_pos * (t * ls_pos) + w_neg * ((1.0 - t) * ls_neg))
    if ignore_value is not None:
        loss = jnp.where(t == jnp.float32(ignore_value), 0.0, loss)
    return loss


def _balance_weights(c_pos, c_neg, gamma):
    num_t = c_pos + c_neg
    pos_w = jnp.power(c_neg / (num_t + 1e-7), gamma)
    neg_w = 1.0 - pos_w
    # NOTE: gamma is applied twice (pow(...) then .pow(gamma)) to exactly mirror
    # the reference PyTorch implementation.
    return jnp.power(pos_w, gamma), jnp.power(neg_w, gamma)


# ----------------------------------------------------------------------------
# wrapper
# ----------------------------------------------------------------------------
def balanced_bce_with_logits(logits, targets, gamma=1.0, ignore_index=None,
                             reduction="mean"):
    assert logits.shape == targets.shape
    orig_shape = logits.shape
    n = int(math.prod(orig_shape)) if len(orig_shape) else 1
    ignore_value = None if ignore_index is None else float(ignore_index)

    # Flatten (no copy-inducing pad, no wrapper dtype upcast).
    x_flat = logits.reshape(-1)
    t_flat = targets.reshape(-1)

    rows = n // LANES
    n_aligned = rows * LANES
    tail = n - n_aligned

    x_bytes = t_bytes = 4
    if rows > 0:
        x2 = (x_flat if tail == 0 else x_flat[:n_aligned]).reshape(rows, LANES)
        t2 = (t_flat if tail == 0 else t_flat[:n_aligned]).reshape(rows, LANES)
        x_bytes = int(x2.dtype.itemsize)
        t_bytes = int(t2.dtype.itemsize)

    params = pltpu.CompilerParams(dimension_semantics=("parallel",),
                                  vmem_limit_bytes=VMEM_LIMIT)

    # ---------------- mean / sum: single fused reduction pass ----------------
    if reduction in ("mean", "sum"):
        s_pos = jnp.float32(0.0)
        s_neg = jnp.float32(0.0)
        c_pos_i = jnp.int32(0)
        c_neg_i = jnp.int32(0)
        if rows > 0:
            tile, num, chunk = _pick_tiles(rows, MAX_TILE_ROWS)
            needs_mask = (num * tile != rows)
            partials = pl.pallas_call(
                functools.partial(_reduce_kernel, valid_rows=rows,
                                  ignore_value=ignore_value,
                                  needs_mask=needs_mask, chunk_rows=chunk),
                out_shape=jax.ShapeDtypeStruct((num * 8, 4 * LANES), jnp.float32),
                grid_spec=pltpu.PrefetchScalarGridSpec(
                    num_scalar_prefetch=0, grid=(num,),
                    in_specs=[pl.BlockSpec((tile, LANES), lambda i: (i, 0)),
                              pl.BlockSpec((tile, LANES), lambda i: (i, 0))],
                    out_specs=pl.BlockSpec((8, 4 * LANES), lambda i: (i, 0))),
                compiler_params=params,
                cost_estimate=pl.CostEstimate(
                    flops=14 * n_aligned, transcendentals=2 * n_aligned,
                    bytes_accessed=n_aligned * (x_bytes + t_bytes)
                    + num * 8 * 4 * LANES * 4),
            )(x2, t2)
            p = partials.reshape(num * 8, 4, LANES)
            s_pos = jnp.sum(p[:, 0, :])
            s_neg = jnp.sum(p[:, 1, :])
            # count partials are exact small ints in f32; re-sum exactly in i32
            c_pos_i = jnp.sum(p[:, 2, :].astype(jnp.int32))
            c_neg_i = jnp.sum(p[:, 3, :].astype(jnp.int32))
        if tail > 0:
            tp, tn, tcp, tcn = _jax_partials(x_flat[n_aligned:],
                                             t_flat[n_aligned:], ignore_value)
            s_pos = s_pos + tp
            s_neg = s_neg + tn
            c_pos_i = c_pos_i + tcp
            c_neg_i = c_neg_i + tcn

        w_pos, w_neg = _balance_weights(c_pos_i.astype(jnp.float32),
                                        c_neg_i.astype(jnp.float32), gamma)
        loss_sum = -(w_pos * s_pos + w_neg * s_neg)
        if reduction == "mean":
            return loss_sum / jnp.float32(n)
        return loss_sum

    # ---------------- 'none' (unreduced): counts -> weights -> loss ----------
    c_pos_i = jnp.int32(0)
    c_neg_i = jnp.int32(0)
    if rows > 0:
        tile_c, num_c, chunk_c = _pick_tiles(rows, MAX_TILE_ROWS)
        needs_mask_c = (num_c * tile_c != rows)
        counts = pl.pallas_call(
            functools.partial(_count_kernel, valid_rows=rows,
                              needs_mask=needs_mask_c, chunk_rows=chunk_c),
            out_shape=jax.ShapeDtypeStruct((num_c * 8, 2 * LANES), jnp.float32),
            grid_spec=pltpu.PrefetchScalarGridSpec(
                num_scalar_prefetch=0, grid=(num_c,),
                in_specs=[pl.BlockSpec((tile_c, LANES), lambda i: (i, 0))],
                out_specs=pl.BlockSpec((8, 2 * LANES), lambda i: (i, 0))),
            compiler_params=params,
            cost_estimate=pl.CostEstimate(
                flops=6 * n_aligned, transcendentals=0,
                bytes_accessed=n_aligned * t_bytes + num_c * 8 * 2 * LANES * 4),
        )(t2)
        c = counts.reshape(num_c * 8, 2, LANES)
        c_pos_i = jnp.sum(c[:, 0, :].astype(jnp.int32))
        c_neg_i = jnp.sum(c[:, 1, :].astype(jnp.int32))
    if tail > 0:
        t_tail_f = t_flat[n_aligned:].astype(jnp.float32)
        c_pos_i = c_pos_i + jnp.sum(t_tail_f == 1.0).astype(jnp.int32)
        c_neg_i = c_neg_i + jnp.sum(t_tail_f == 0.0).astype(jnp.int32)

    w_pos, w_neg = _balance_weights(c_pos_i.astype(jnp.float32),
                                    c_neg_i.astype(jnp.float32), gamma)

    pieces = []
    if rows > 0:
        tile_l, num_l, _ = _pick_tiles(rows, MAX_TILE_ROWS_ELEM)
        w = jnp.stack([w_pos, w_neg]).astype(jnp.float32)
        per_elem = pl.pallas_call(
            functools.partial(_loss_kernel, ignore_value=ignore_value),
            out_shape=jax.ShapeDtypeStruct((rows, LANES), jnp.float32),
            grid_spec=pltpu.PrefetchScalarGridSpec(
                num_scalar_prefetch=1, grid=(num_l,),
                in_specs=[pl.BlockSpec((tile_l, LANES), lambda i, w: (i, 0)),
                          pl.BlockSpec((tile_l, LANES), lambda i, w: (i, 0))],
                out_specs=pl.BlockSpec((tile_l, LANES), lambda i, w: (i, 0))),
            compiler_params=params,
            cost_estimate=pl.CostEstimate(
                flops=12 * n_aligned, transcendentals=2 * n_aligned,
                bytes_accessed=n_aligned * (x_bytes + t_bytes + 4)),
        )(w, x2, t2)
        pieces.append(per_elem.reshape(-1))
    if tail > 0:
        pieces.append(_jax_loss(x_flat[n_aligned:], t_flat[n_aligned:],
                                w_pos, w_neg, ignore_value))
    out = pieces[0] if len(pieces) == 1 else jnp.concatenate(pieces)
    return out.reshape(orig_shape)


class BalancedBCEWithLogitsLoss:
    """JAX/Pallas port of the PyTorch BalancedBCEWithLogitsLoss module."""

    def __init__(self, gamma: float = 1.0, reduction: str = "mean",
                 ignore_index=None):
        self.gamma = gamma
        self.reduction = reduction
        self.ignore_index = ignore_index

    def __call__(self, output, target):
        return balanced_bce_with_logits(
            output, target, gamma=self.gamma,
            ignore_index=self.ignore_index, reduction=self.reduction)


# ----------------------------------------------------------------------------
# pure-JAX reference mirroring the PyTorch function
# ----------------------------------------------------------------------------
def _reference(logits, targets, gamma=1.0, ignore_index=None, reduction="mean"):
    logits = logits.astype(jnp.float32)
    targets = targets.astype(jnp.float32)
    pos_t = jnp.sum(targets == 1.0).astype(jnp.float32)
    neg_t = jnp.sum(targets == 0.0).astype(jnp.float32)
    num_t = pos_t + neg_t
    pos_w = jnp.power(neg_t / (num_t + 1e-7), gamma)
    neg_w = 1.0 - pos_w
    logsig = jax.nn.log_sigmoid
    pos_term = jnp.power(pos_w, gamma) * targets * logsig(logits)
    neg_term = jnp.power(neg_w, gamma) * (1.0 - targets) * logsig(-logits)
    loss = -(pos_term + neg_term)
    if ignore_index is not None:
        loss = jnp.where(targets == ignore_index, 0.0, loss)
    if reduction == "mean":
        return jnp.mean(loss)
    if reduction == "sum":
        return jnp.sum(loss)
    return loss


if __name__ == "__main__":
    key = jax.random.PRNGKey(0)
    k1, k2, k3, k4, k5, k6 = jax.random.split(key, 6)

    # ---- NCHW logits, hard 0/1 targets, 128-aligned element count ----------
    logits = jax.random.normal(k1, (2, 4, 16, 16), dtype=jnp.float32)
    targets = (jax.random.uniform(k2, (2, 4, 16, 16)) > 0.5).astype(jnp.float32)

    loss_fn = BalancedBCEWithLogitsLoss(gamma=1.0, reduction="mean")
    lm = jax.block_until_ready(loss_fn(logits, targets))
    lm_ref = _reference(logits, targets, reduction="mean")
    assert jnp.allclose(lm, lm_ref, rtol=1e-5, atol=1e-6), (lm, lm_ref)

    ls = jax.block_until_ready(
        balanced_bce_with_logits(logits, targets, reduction="sum"))
    ls_ref = _reference(logits, targets, reduction="sum")
    assert jnp.allclose(ls, ls_ref, rtol=1e-5, atol=1e-3), (ls, ls_ref)

    ln = jax.block_until_ready(
        balanced_bce_with_logits(logits, targets, reduction="none"))
    ln_ref = _reference(logits, targets, reduction="none")
    assert ln.shape == logits.shape
    assert jnp.allclose(ln, ln_ref, rtol=1e-5, atol=1e-6)

    li = jax.block_until_ready(balanced_bce_with_logits(
        logits, targets, gamma=2.0, ignore_index=0, reduction="mean"))
    li_ref = _reference(logits, targets, gamma=2.0, ignore_index=0,
                        reduction="mean")
    assert jnp.allclose(li, li_ref, rtol=1e-5, atol=1e-6), (li, li_ref)

    # ---- ragged element count (2500 = 19*128 + 68): mask + JAX tail --------
    rl = jax.random.normal(k3, (1, 1, 50, 50), dtype=jnp.float32)
    rt = (jax.random.uniform(k4, (1, 1, 50, 50)) > 0.3).astype(jnp.float32)
    rm = jax.block_until_ready(balanced_bce_with_logits(rl, rt, reduction="mean"))
    rm_ref = _reference(rl, rt, reduction="mean")
    assert jnp.allclose(rm, rm_ref, rtol=1e-5, atol=1e-6), (rm, rm_ref)
    rn = jax.block_until_ready(balanced_bce_with_logits(rl, rt, reduction="none"))
    rn_ref = _reference(rl, rt, reduction="none")
    assert rn.shape == rl.shape
    assert jnp.allclose(rn, rn_ref, rtol=1e-5, atol=1e-6)

    # ---- larger input exercising the multi-chunk in-kernel accumulator -----
    bl = jax.random.normal(k5, (2, 8, 96, 96), dtype=jnp.float32)
    bt = (jax.random.uniform(k6, (2, 8, 96, 96)) > 0.5).astype(jnp.float32)
    bm = jax.block_until_ready(balanced_bce_with_logits(bl, bt, reduction="mean"))
    bm_ref = _reference(bl, bt, reduction="mean")
    assert jnp.allclose(bm, bm_ref, rtol=2e-5, atol=1e-6), (bm, bm_ref)

    print("KERNEL_OK")
</pallas_src>

<mosaic_0001>
module attributes {stable_mosaic.version = 11 : i64} {
  func.func @_reduce_kernel(%arg0: i32, %arg1: memref<8x128xf32, #tpu.memory_space<vmem>>, %arg2: memref<8x128xf32, #tpu.memory_space<vmem>>, %arg3: memref<8x512xf32, #tpu.memory_space<vmem>>) attributes {dimension_semantics = [#tpu.dimension_semantics<parallel>], iteration_bounds = array<i64: 2>, scalar_prefetch = 0 : i64, scratch_operands = 0 : i64, tpu.core_type = #tpu.core_type<tc>, window_params = [{transform_indices = @transform_0, window_bounds = array<i64: 8, 128>}, {transform_indices = @transform_1, window_bounds = array<i64: 8, 128>}, {transform_indices = @transform_2, window_bounds = array<i64: 8, 512>}]} {
    %cst = arith.constant 0.000000e+00 : f32
    %0 = vector.broadcast %cst : f32 to vector<8x128xf32>
    %c0 = arith.constant 0 : index
    %c0_0 = arith.constant 0 : index
    %1 = vector.load %arg1[%c0, %c0_0] : memref<8x128xf32, #tpu.memory_space<vmem>>, vector<8x128xf32>
    %c0_1 = arith.constant 0 : index
    %c0_2 = arith.constant 0 : index
    %2 = vector.load %arg2[%c0_1, %c0_2] : memref<8x128xf32, #tpu.memory_space<vmem>>, vector<8x128xf32>
    %3 = math.absf %1 : vector<8x128xf32>
    %cst_3 = arith.constant 0.000000e+00 : f32
    %4 = vector.broadcast %cst_3 : f32 to vector<8x128xf32>
    %5 = arith.subf %4, %3 : vector<8x128xf32>
    %6 = math.exp %5 : vector<8x128xf32>
    %7 = math.log1p %6 : vector<8x128xf32>
    %cst_4 = arith.constant 0.000000e+00 : f32
    %8 = vector.broadcast %cst_4 : f32 to vector<8x128xf32>
    %9 = arith.minimumf %1, %8 : vector<8x128xf32>
    %10 = arith.subf %9, %7 : vector<8x128xf32>
    %cst_5 = arith.constant 0.000000e+00 : f32
    %11 = vector.broadcast %cst_5 : f32 to vector<8x128xf32>
    %12 = arith.maximumf %1, %11 : vector<8x128xf32>
    %cst_6 = arith.constant 0.000000e+00 : f32
    %13 = vector.broadcast %cst_6 : f32 to vector<8x128xf32>
    %14 = arith.subf %13, %12 : vector<8x128xf32>
    %15 = arith.subf %14, %7 : vector<8x128xf32>
    %cst_7 = arith.constant 1.000000e+00 : f32
    %16 = vector.broadcast %cst_7 : f32 to vector<8x128xf32>
    %17 = arith.cmpf oeq, %2, %16 : vector<8x128xf32>
    %cst_8 = arith.constant 0.000000e+00 : f32
    %18 = vector.broadcast %cst_8 : f32 to vector<8x128xf32>
    %19 = arith.cmpf oeq, %2, %18 : vector<8x128xf32>
    %cst_9 = arith.constant 0.000000e+00 : f32
    %20 = vector.broadcast %cst_9 : f32 to vector<8x128xf32>
    %21 = arith.select %17, %10, %20 : vector<8x128xi1>, vector<8x128xf32>
    %22 = vector.shape_cast %21 : vector<8x128xf32> to vector<1x8x128xf32>
    %cst_10 = arith.constant dense<0.000000e+00> : vector<8x128xf32>
    %23 = vector.multi_reduction <add>, %22, %cst_10 [0] : vector<1x8x128xf32> to vector<8x128xf32>
    %24 = arith.addf %0, %23 : vector<8x128xf32>
    %cst_11 = arith.constant 0.000000e+00 : f32
    %25 = vector.broadcast %cst_11 : f32 to vector<8x128xf32>
    %26 = arith.select %19, %15, %25 : vector<8x128xi1>, vector<8x128xf32>
    %27 = vector.shape_cast %26 : vector<8x128xf32> to vector<1x8x128xf32>
    %cst_12 = arith.constant dense<0.000000e+00> : vector<8x128xf32>
    %28 = vector.multi_reduction <add>, %27, %cst_12 [0] : vector<1x8x128xf32> to vector<8x128xf32>
    %29 = arith.addf %0, %28 : vector<8x128xf32>
    %cst_13 = arith.constant 1.000000e+00 : f32
    %cst_14 = arith.constant 0.000000e+00 : f32
    %30 = vector.broadcast %cst_13 : f32 to vector<8x128xf32>
    %31 = vector.broadcast %cst_14 : f32 to vector<8x128xf32>
    %32 = arith.select %17, %30, %31 : vector<8x128xi1>, vector<8x128xf32>
    %33 = vector.shape_cast %32 : vector<8x128xf32> to vector<1x8x128xf32>
    %cst_15 = arith.constant dense<0.000000e+00> : vector<8x128xf32>
    %34 = vector.multi_reduction <add>, %33, %cst_15 [0] : vector<1x8x128xf32> to vector<8x128xf32>
    %35 = arith.addf %0, %34 : vector<8x128xf32>
    %cst_16 = arith.constant 1.000000e+00 : f32
    %cst_17 = arith.constant 0.000000e+00 : f32
    %36 = vector.broadcast %cst_16 : f32 to vector<8x128xf32>
    %37 = vector.broadcast %cst_17 : f32 to vector<8x128xf32>
    %38 = arith.select %19, %36, %37 : vector<8x128xi1>, vector<8x128xf32>
    %39 = vector.shape_cast %38 : vector<8x128xf32> to vector<1x8x128xf32>
    %cst_18 = arith.constant dense<0.000000e+00> : vector<8x128xf32>
    %40 = vector.multi_reduction <add>, %39, %cst_18 [0] : vector<1x8x128xf32> to vector<8x128xf32>
    %41 = arith.addf %0, %40 : vector<8x128xf32>
    %c0_19 = arith.constant 0 : index
    %c0_20 = arith.constant 0 : index
    %42 = vector.load %arg3[%c0_19, %c0_20] : memref<8x512xf32, #tpu.memory_space<vmem>>, vector<8x128xf32>
    tpu.vector_store %arg3[%c0_19, %c0_20], %24 {strides = array<i32>} : memref<8x512xf32, #tpu.memory_space<vmem>>, vector<8x128xf32>,
    %c0_21 = arith.constant 0 : index
    %c128 = arith.constant 128 : index
    %43 = vector.load %arg3[%c0_21, %c128] : memref<8x512xf32, #tpu.memory_space<vmem>>, vector<8x128xf32>
    tpu.vector_store %arg3[%c0_21, %c128], %29 {strides = array<i32>} : memref<8x512xf32, #tpu.memory_space<vmem>>, vector<8x128xf32>,
    %c0_22 = arith.constant 0 : index
    %c256 = arith.constant 256 : index
    %44 = vector.load %arg3[%c0_22, %c256] : memref<8x512xf32, #tpu.memory_space<vmem>>, vector<8x128xf32>
    tpu.vector_store %arg3[%c0_22, %c256], %35 {strides = array<i32>} : memref<8x512xf32, #tpu.memory_space<vmem>>, vector<8x128xf32>,
    %c0_23 = arith.constant 0 : index
    %c384 = arith.constant 384 : index
    %45 = vector.load %arg3[%c0_23, %c384] : memref<8x512xf32, #tpu.memory_space<vmem>>, vector<8x128xf32>
    tpu.vector_store %arg3[%c0_23, %c384], %41 {strides = array<i32>} : memref<8x512xf32, #tpu.memory_space<vmem>>, vector<8x128xf32>,
    return
  }
  func.func @transform_0(%arg0: i32) -> (i32, i32) {
    %c0_i32 = arith.constant 0 : i32
    %c0_i32_0 = arith.constant 0 : i32
    return %arg0, %c0_i32 : i32, i32
  }
  func.func @transform_1(%arg0: i32) -> (i32, i32) {
    %c0_i32 = arith.constant 0 : i32
    %c0_i32_0 = arith.constant 0 : i32
    return %arg0, %c0_i32 : i32, i32
  }
  func.func @transform_2(%arg0: i32) -> (i32, i32) {
    %c0_i32 = arith.constant 0 : i32
    %c0_i32_0 = arith.constant 0 : i32
    return %arg0, %c0_i32 : i32, i32
  }
}

</mosaic_0001>

<bundles_post_ra>
// kernel: tpu_custom_call.1
= control target key start
LH: loop header
LB: loop body
LE: loop exit
PB: predicated region body
PF: predicated region fallthrough
CT: control target
= control target key end

     0   :  { %7 = vsyncpa [#allocation3], 0  ;;  %s771_s0 = inlined_call_operand.hbm [shape: f32[16,128], index: 0, kind: input, shape index: {}]   ;;  %s772_s1 = inlined_call_operand.hbm [shape: f32[16,128], index: 1, kind: input, shape index: {}]   ;;  %s773_s2 = inlined_call_operand.hbm [shape: f32[16,512], index: 2, kind: output, shape index: {}]  }
   0x1   :  { %9 = vsyncpa [#allocation3 + $0x1], 0 }
   0x2   :  { %10 = vsyncpa [#allocation6], 0 }
   0x3   :  { %12 = vsyncpa [#allocation6 + $0x1], 0 }
   0x4   :  { %13 = vsyncpa [#allocation4], 0 }
   0x5   :  { %15 = vsyncpa [#allocation4 + $0x1], 0  ;;  %s560_s9 = smov 0   ;;  %s562_s10 = smov 0  }
   0x6   :  { %s564_s11 = smov 0   ;;  %s566_s12 = smov 0  }
   0x7 LB: > { %s581_s13 = sadd.s32 4294967295, %s539_s12   ;;  %s342_s14 = sadd.s32 4294967294, %s539_s12   ;;  %s539_s12 = sphi %s566_s12, %s792_s12   ;;  %s535_s11 = sphi %s564_s11, %s791_s11   ;;  %s531_s10 = sphi %s562_s10, %s790_s10   ;;  %s527_s9 = sphi %s560_s9, %s789_s9  }
   0x8   : > { %s585_s15 = sadd.s32 1, %s539_s12   ;;  %s28_s16 = sadd.s32 1, %s535_s11 }
   0x9   : > { %s25_s17 = ssub.s32 %s539_s12, %s585_s15  ;;  %p35_p0 = scmp.ne.s32.totalorder %s535_s11, %s531_s10 }
   0xa   : > { %p26_p1 = scmp.eq.s32.totalorder %s25_s17, 0  ;;  %p36_p2 = scmp.eq.s32.totalorder %s539_s12, 0 }
   0xb   : > { %p41_p3 = scmp.ne.s32.totalorder %s531_s10, %s527_s9  ;;  %p42_p4 = scmp.eq.s32.totalorder %s581_s13, 0 }
   0xc   : > { %s597_s18 = scalar_select %p26_p1, %s535_s11, %s28_s16  }
   0xd   : > { %p599_p5 = por %p36_p2, %p35_p0  ;;  %p603_p6 = por %p42_p4, %p41_p3 }
   0xe   : > { %p91_p7 = scmp.eq.s32.totalorder %s581_s13, 1  ;;  %p97_p8 = scmp.eq.s32.totalorder %s342_s14, 1 }
   0xf   : > { %s777_s20 = scalar_select %p603_p6, 1, 0 }
  0x10   : > { %p376_p10 = scmp.lt.s32.totalorder %s539_s12, 2  ;;  %p610_p11 = por %p91_p7, %p35_p0 }
  0x11   : > { %p614_p12 = por %p97_p8, %p41_p3  ;;  %s619_s23 = sand.u32 1, %s535_s11  }
  0x12   : > { %s778_s21 = scalar_select %p610_p11, 1, 0 }
  0x13   : > { %s779_s22 = scalar_select %p614_p12, 1, 0 }
  0x14   : > { %s346_s24 = sshll.u32 %s539_s12, 7  ;;  %s345_s25 = sshll.u32 %s619_s23, 3 }
  0x15   : > { %s628_s28 = scalar_lea.hbm %s771_s0, %s346_s24  ;;  %s121_s29 = scalar_lea.vmem [#allocation2], %s345_s25 }
  0x16   : > { %s128_s30 = sshll.u32 %s121_s29, 4  ;;  %p634_p13 = pnand %p376_p10, %p599_p5  ;;  %s638_s30 = int_to_ptr.vmem [resolvable:$true] %s128_s30 }
  0x17   : > { %s118_s4 = scalar_lea.sflag [#allocation3], %s619_s23  ;;  %s415_s5 = scalar_lea.hbm %s628_s28, 128 }
  0x18   : > { %p416_p2 = scmp.ne.s32.totalorder %s628_s28, %s415_s5  ;;  %p417_p3 = pneg %p634_p13 }
  0x19   : > { %s420_s8 = scalar_lea.hbm %s771_s0, 256  ;;  %p421_p5 = scmp.lt.s32.totalorder %s628_s28, %s771_s0 }
  0x1a   : > { %p418_p4 = pnand %p417_p3, %p416_p2  ;;  %p422_p8 = scmp.lt.s32.totalorder %s420_s8, %s415_s5 }
  0x1c   : > { %p419_p7 = pneg %p418_p4  ;;  %p423_p10 = por %p422_p8, %p421_p5 }
  0x1e   : > { %p424_p9 = pnand %p423_p10, %p419_p7 }
  0x20   : > { %427 = shalt.err (!%p424_p9)
}
  0x21   : > { %s428_s17 = scalar_lea.vmem %s638_s30, 128  ;;  %s541_s19 = smov [#allocation2]  }
  0x22   : > { %p429_p0 = scmp.ne.s32.totalorder %s638_s30, %s428_s17  ;;  %s433_s26 = sshll.u32 %s541_s19, 4  ;;  %s434_s26 = int_to_ptr.vmem [resolvable:$false] %s433_s26 }
  0x23   : > { %s435_s27 = scalar_lea.vmem %s434_s26, 256  ;;  %p436_p1 = scmp.lt.s32.totalorder %s638_s30, %s434_s26 }
  0x24   : > { %p431_p2 = pnand %p429_p0, %p417_p3  ;;  %p437_p12 = scmp.lt.s32.totalorder %s435_s27, %s428_s17 }
  0x26   : > { %p432_p4 = pneg %p431_p2  ;;  %p438_p11 = por %p437_p12, %p436_p1 }
  0x28   : > { %p439_p5 = pnand %p438_p11, %p432_p4 }
  0x2a   : > { %442 = shalt.err (!%p439_p5)
}
  0x2b   : > { %368 = dma.hbm_to_vmem [thread:$0]  (!%p634_p13), %s628_s28, 128, %s638_s30, %s118_s4  }
  0x2c   : > { %p781_p9 = scmp.lt.s32.totalorder %s539_s12, 3  ;;  %p782_p0 = scmp.ge.s32.totalorder %s539_s12, 1 }
  0x2d   : > { %s680_s7 = scalar_lea.hbm %s772_s1, %s346_s24  ;;  %s139_s8 = scalar_lea.vmem [#allocation5], %s345_s25 }
  0x2e   : > { %p671_p7 = pnand %p782_p0, %p781_p9  ;;  %s146_s14 = sshll.u32 %s139_s8, 4  ;;  %s147_s14 = int_to_ptr.vmem [resolvable:$true] %s146_s14 }
  0x2f   : > { %s136_s28 = scalar_lea.sflag [#allocation6], %s619_s23  ;;  %s443_s30 = scalar_lea.hbm %s680_s7, 128 }
  0x30   : > { %s783_s29 = scalar_select %p671_p7, 1, 0 }
  0x31   : > { %p444_p11 = scmp.ne.s32.totalorder %s680_s7, %s443_s30  ;;  %s448_s17 = scalar_lea.hbm %s772_s1, 256 }
  0x32   : > { %p449_p8 = scmp.lt.s32.totalorder %s680_s7, %s772_s1  ;;  %p450_p10 = scmp.lt.s32.totalorder %s448_s17, %s443_s30 }
  0x33   : > { %p446_p12 = pnand %p444_p11, %p417_p3 }
  0x34   : > { %p451_p2 = por %p450_p10, %p449_p8 }
  0x35   : > { %p447_p1 = pneg %p446_p12 }
  0x37   : > { %p452_p4 = pnand %p451_p2, %p447_p1 }
  0x39   : > { %455 = shalt.err (!%p452_p4)
}
  0x3a   : > { %s456_s25 = scalar_lea.vmem %s147_s14, 128  ;;  %s542_s23 = smov [#allocation5]  }
  0x3b   : > { %p457_p5 = scmp.ne.s32.totalorder %s147_s14, %s456_s25  ;;  %s461_s26 = sshll.u32 %s542_s23, 4  ;;  %s462_s26 = int_to_ptr.vmem [resolvable:$false] %s461_s26 }
  0x3c   : > { %s463_s27 = scalar_lea.vmem %s462_s26, 256  ;;  %p464_p11 = scmp.lt.s32.totalorder %s147_s14, %s462_s26 }
  0x3d   : > { %p459_p9 = pnand %p457_p5, %p417_p3  ;;  %p465_p12 = scmp.lt.s32.totalorder %s463_s27, %s456_s25 }
  0x3f   : > { %p460_p0 = pneg %p459_p9  ;;  %p466_p6 = por %p465_p12, %p464_p11 }
  0x41   : > { %p467_p7 = pnand %p466_p6, %p460_p0 }
  0x43   : > { %470 = shalt.err (!%p467_p7)
}
  0x44   : > { %371 = dma.hbm_to_vmem [thread:$0]  (!%p634_p13), %s680_s7, 128, %s147_s14, %s136_s28  }
  0x45   : > { %p784_p1 = scmp.ne.s32.totalorder %s783_s29, 0 }
  0x46   : > { %s706_s5 = sand.u32 (!%p784_p1), 1, %s531_s10   ;;  %p785_p3 = scmp.ne.s32.totalorder (!%p784_p1), %s777_s20, 0 }
  0x47   : > { %155 = sbr.rel (%p784_p1) target bundleno = 135 (0x87), region = 28  ;;  %s350_s6 = sshll.u32 (!%p784_p1), %s706_s5, 3 }
  0x48   : > { %s158_s8 = scalar_lea.sflag (!%p784_p1), [#allocation3], %s706_s5  ;;  %s161_s30 = scalar_lea.vmem (!%p784_p1), [#allocation2], %s350_s6 }
  0x4c   : > { %514 = dma.done.wait (%p785_p3), %s158_s8, 128  }
  0x4d   : > { %516 = vsyncadd (%p785_p3), %s158_s8, 4294967168  ;;  %s167_s3 = scalar_lea.sflag [#allocation6], %s706_s5  ;;  %s170_s7 = scalar_lea.vmem [#allocation5], %s350_s6 }
  0x4e   : > { %518 = dma.done.wait (%p785_p3), %s167_s3, 128  }
  0x4f   : > { %520 = vsyncadd (%p785_p3), %s167_s3, 4294967168  ;;  %s352_s29 = sshll.u32 %s706_s5, 5  ;;  %v196_v0 = vld [vmem:[%s161_s30] sm:$0xff]  ;;  %v197_v1 = vld [vmem:[%s170_s7] sm:$0xff]  ;;  %v543_v3 = vmov 0.0   ;;  %s358_s28 = sshll.u32 %s581_s13, 9 }
  0x50   : > { %v198_v2 = vand.u32 2147483647, %v196_v0  ;;  %vm216_vm0 = vcmp.eq.f32.partialorder %v197_v1, 1.0  ;;  %vm217_vm1 = vcmp.eq.f32.partialorder %v197_v1, 0.0  ;;  %s195_s14 = scalar_lea.vmem [#allocation7], %s352_s29  ;;  %v213_v13 = vmax.f32 %v196_v0, 0.0  ;;  %s728_s17 = scalar_lea.hbm %s773_s2, %s358_s28 }
  0x51   : > { %v224_v4 = vsel %vm216_vm0, 1.0, %v543_v3  ;;  %v227_v6 = vsel %vm217_vm1, 1.0, %v543_v3  ;;  %v211_v16 = vmin.f32 %v196_v0, 0.0  ;;  %s249_s20 = sshll.u32 %s195_s14, 4  ;;  %s235_s13 = scalar_lea.sflag [#allocation4], %s706_s5  ;;  %s723_s20 = int_to_ptr.vmem [resolvable:$true] %s249_s20 }
  0x52   : > { %v199_v5 = vsub.f32 0.0, %v198_v2  ;;  %232 = vst [vmem:[%s195_s14 + $0x10] sm:$0xff] %v224_v4  ;;  %233 = vst [vmem:[%s195_s14 + $0x18] sm:$0xff] %v227_v6  ;;  %v214_v17 = vsub.f32 0.0, %v213_v13  ;;  %s471_s24 = scalar_lea.vmem %s723_s20, 512  ;;  %p786_p13 = scmp.ne.s32.totalorder %s778_s21, 0 }
  0x53   : > { %p472_p6 = scmp.ne.s32.totalorder %s723_s20, %s471_s24  ;;  %s544_s19 = smov [#allocation7]  }
  0x54   : > { %v200_v7 = vmul.f32 1.442695, %v199_v5  ;;  %s475_s25 = sshll.u32 %s544_s19, 4  ;;  %s476_s25 = int_to_ptr.vmem [resolvable:$false] %s475_s25 }
  0x55   : > { %p473_p7 = pnand %p472_p6, %p786_p13  ;;  %s477_s23 = scalar_lea.vmem %s476_s25, 1024 }
  0x56   : > { %411 = vpow2.f32 %v200_v7  ;;  %p478_p10 = scmp.lt.s32.totalorder %s723_s20, %s476_s25  ;;  %p479_p2 = scmp.lt.s32.totalorder %s477_s23, %s471_s24 }
  0x57   : > { %p474_p8 = pneg %p473_p7 }
  0x58   : > { %p480_p4 = por %p479_p2, %p478_p10 }
  0x5a   : > { %p481_p5 = pnand %p480_p4, %p474_p8 }
  0x63   : > { %v412_v8 = vpop.eup %411 }
  0x64   : > { %v202_v9 = vadd.f32 1.0, %v412_v8  ;;  %v205_v10 = vmul.f32 -0.5, %v412_v8  ;;  %v208_v12 = vand.u32 2147483647, %v412_v8 }
  0x66   : > { %413 = vlog2.f32 %v202_v9  ;;  %v206_v11 = vadd.f32 1.0, %v205_v10  ;;  %vm209_vm2 = vcmp.lt.f32.partialorder %v208_v12, 0.0004427343 }
  0x68   : > { %v207_v14 = vmul.f32 %v412_v8, %v206_v11 }
  0x73   : > { %v414_v15 = vpop.eup %413 }
  0x74   : > { %v204_v18 = vmul.f32 0.6931472, %v414_v15 }
  0x76   : > { %v210_v19 = vsel %vm209_vm2, %v207_v14, %v204_v18 }
  0x77   : > { %v212_v20 = vsub.f32 %v211_v16, %v210_v19  ;;  %v215_v21 = vsub.f32 %v214_v17, %v210_v19 }
  0x79   : > { %v218_v22 = vsel %vm216_vm0, %v212_v20, 0.0  ;;  %v221_v23 = vsel %vm217_vm1, %v215_v21, 0.0 }
  0x7a   : > { %230 = vst [vmem:[%s195_s14] sm:$0xff] %v218_v22  ;;  %231 = vst [vmem:[%s195_s14 + $0x8] sm:$0xff] %v221_v23 }
  0x7b   : > { %484 = shalt.err (!%p481_p5)
}
  0x7c   : > { %s485_s26 = scalar_lea.hbm %s728_s17, 512  ;;  %s489_s6 = scalar_lea.hbm %s773_s2, 1024 }
  0x7d   : > { %p486_p9 = scmp.ne.s32.totalorder %s728_s17, %s485_s26  ;;  %p490_p12 = scmp.lt.s32.totalorder %s728_s17, %s773_s2 }
  0x7e   : > { %p491_p1 = scmp.lt.s32.totalorder %s489_s6, %s485_s26 }
  0x7f   : > { %p487_p0 = pnand %p486_p9, %p786_p13 }
  0x80   : > { %p492_p3 = por %p491_p1, %p490_p12 }
  0x81   : > { %p488_p11 = pneg %p487_p0 }
  0x83   : > { %p493_p6 = pnand %p492_p3, %p488_p11 }
  0x85   : > { %496 = shalt.err (!%p493_p6)
}
  0x86   : > { %363 = dma.vmem_to_hbm [thread:$0]  (%p786_p13), %s723_s20, 512, %s728_s17, %s235_s13  }
  0x87 PF: > { %s261_s3 = sand.u32 1, %s527_s9   ;;  %p787_p7 = scmp.ne.s32.totalorder %s779_s22, 0 }
  0x88   : > { %p788_p8 = scmp.ge.s32.totalorder %s539_s12, 2  ;;  %s262_s7 = scalar_lea.sflag [#allocation4], %s261_s3 }
  0x8a   : > { %p373_p10 = pnand %p788_p8, %p787_p7 }
  0x8c   : > { %p374_p2 = pneg %p373_p10 }
  0x8e   : > { %522 = dma.done.wait (%p374_p2), %s262_s7, 512  }
  0x8f   : > { %524 = vsyncadd (%p374_p2), %s262_s7, 4294966784  ;;  %p18_p4 = scmp.ge.s32.totalorder %s585_s15, 4   ;;  %s789_s9 = smov %s531_s10 }
  0x90   : > { %s790_s10 = smov %s535_s11  ;;  %s791_s11 = smov %s597_s18 }
  0x91   : > { %s792_s12 = smov %s585_s15  ;;  %20 = sbr.rel (!%p18_p4) target bundleno = 7 (0x7), region = 86 }
  0x96   :  { %267 = vsyncpa [#allocation3], 1 }
  0x97   :  { %269 = vsyncpa [#allocation3 + $0x1], 1 }
  0x98   :  { %270 = vsyncpa [#allocation6], 1 }
  0x99   :  { %272 = vsyncpa [#allocation6 + $0x1], 1 }
  0x9a   :  { %273 = vsyncpa [#allocation4], 1 }
  0x9b   :  { %275 = vsyncpa [#allocation4 + $0x1], 1 }

</bundles_post_ra>
